<compile_context>
chip_gen: v5e
topology: v5e:2x2
jax: 0.10.0
libtpu: 0.0.40
codegen_flags: <defaults>
</compile_context>

<pallas_src>
import functools

import jax
import jax.numpy as jnp
import numpy as np
from jax.experimental import pallas as pl
from jax.experimental.pallas import tpu as pltpu


def _round_up(a, b):
    return ((a + b - 1) // b) * b


def _round_down(a, b):
    return (a // b) * b


def _cdiv(a, b):
    return (a + b - 1) // b


# --------------------------------------------------------------------------- #
# Kernels
# --------------------------------------------------------------------------- #
def _gem_kernel_int_p(invden_ref, x_ref, m_ref, o_ref, acc_ref, *,
                      eps, p_int, inv_p, seq_len, ts):
    # invden_ref: SMEM (B,)        f32 = 1 / clip(sum_s mask, eps)
    # x_ref:      VMEM (1, tS, tH) native dtype
    # m_ref:      VMEM (1, tS, 1)  f32
    # o_ref:      VMEM (1, 1, tH)  x.dtype
    # acc_ref:    VMEM (1, 1, tH)  f32 scratch accumulator
    b = pl.program_id(0)
    k = pl.program_id(2)
    nk = pl.num_programs(2)

    @pl.when(k == 0)
    def _():
        acc_ref[...] = jnp.zeros_like(acc_ref)

    x = x_ref[...].astype(jnp.float32)          # cast after DMA; accumulate in f32
    m = m_ref[...]                              # (1, tS, 1), broadcasts over lanes

    if seq_len % ts != 0:
        # Ragged last sequence tile: rows >= seq_len hold unspecified data
        # (there is no HBM padding) -- kill them exactly (avoid NaN * 0).
        rows = k * ts + jax.lax.broadcasted_iota(jnp.int32, m.shape, 1)
        in_bounds = rows < seq_len
        m = jnp.where(in_bounds, m, 0.0)
        x = jnp.where(in_bounds, x, 0.0)

    masked = jnp.maximum(x, eps) * m            # clamp then mask (reference order)

    # Integer power via exponentiation-by-squaring: pure VPU, no EUP.
    pw = None
    base = masked
    e = p_int
    while e > 0:
        if e & 1:
            pw = base if pw is None else pw * base
        e >>= 1
        if e:
            base = base * base

    acc_ref[...] += jnp.sum(pw, axis=1, keepdims=True)       # (1, 1, tH)

    @pl.when(k == nk - 1)
    def _():
        ratio = acc_ref[...] * invden_ref[b]                 # multiply, not divide
        pos = ratio > 0.0
        safe = jnp.where(pos, ratio, 1.0)
        out = jnp.where(pos, jnp.exp(inv_p * jnp.log(safe)), 0.0)
        o_ref[...] = out.astype(o_ref.dtype)


def _gem_kernel_general(scal_ref, invden_ref, x_ref, m_ref, o_ref, acc_ref, *,
                        eps, seq_len, ts):
    # scal_ref: SMEM (2,) = [p, 1/p]; everything else as in the int-p kernel.
    b = pl.program_id(0)
    k = pl.program_id(2)
    nk = pl.num_programs(2)

    @pl.when(k == 0)
    def _():
        acc_ref[...] = jnp.zeros_like(acc_ref)

    p = scal_ref[0]
    x = x_ref[...].astype(jnp.float32)
    m = m_ref[...]

    if seq_len % ts != 0:
        rows = k * ts + jax.lax.broadcasted_iota(jnp.int32, m.shape, 1)
        m = jnp.where(rows < seq_len, m, 0.0)

    masked = jnp.maximum(x, eps) * m
    # Guard derived from the small (1, tS, 1) mask, not the full tile.
    valid = m > 0.0
    safe = jnp.where(valid, masked, 1.0)        # keep log's argument > 0
    pw = jnp.where(valid, jnp.exp(p * jnp.log(safe)), 0.0)   # 0^p := 0 (p > 0)

    acc_ref[...] += jnp.sum(pw, axis=1, keepdims=True)

    @pl.when(k == nk - 1)
    def _():
        inv_p = scal_ref[1]
        ratio = acc_ref[...] * invden_ref[b]
        pos = ratio > 0.0
        safe_r = jnp.where(pos, ratio, 1.0)
        out = jnp.where(pos, jnp.exp(inv_p * jnp.log(safe_r)), 0.0)
        o_ref[...] = out.astype(o_ref.dtype)


# --------------------------------------------------------------------------- #
# Tiling
# --------------------------------------------------------------------------- #
def _pick_tiles(B, S, H, itemsize):
    # Hidden (lane) tile: lane-dense multiple of 128 where possible, full H when
    # H < 128.  A block dim never exceeds the array dim (only trailing ragged
    # parts of a tile can be out of bounds).
    if H < 128:
        tH = H
    elif H % 128 == 0:
        tH = min(H, 512)
    else:
        tH = min(512, _round_down(H, 128))
    # v7x megacore: ensure >= 2 parallel grid tiles when B == 1.
    if B == 1 and H >= 256 and _cdiv(H, tH) < 2:
        tH = _round_up(_cdiv(H, 2), 128)

    # Sequence (reduction) tile: grow until the x tile is ~2 MiB per buffer
    # (double-buffered by the BlockSpec pipeline); cap at 1024 rows so the
    # full-tile f32 intermediates stay comfortable on v5e (16 MiB scoped default).
    target_x_bytes = 2 * 1024 * 1024
    if S < 8:
        tS = S
    else:
        budget_rows = _round_down(max(8, target_x_bytes // (tH * itemsize)), 8)
        tS = max(8, min(budget_rows, 1024, _round_down(S, 8)))
    return tH, tS


# --------------------------------------------------------------------------- #
# Wrapper
# --------------------------------------------------------------------------- #
def gem_text_pallas(x, attention_mask, p, eps=1e-6):
    """x: [B, S, H] (any float dtype), attention_mask: [B, S], p: scalar / [1]."""
    B, S, H = x.shape
    itemsize = jnp.dtype(x.dtype).itemsize

    mask_f32 = attention_mask.astype(jnp.float32)
    # den is identical for every hidden unit -> tiny per-batch reduce outside.
    inv_den = (1.0 / jnp.maximum(jnp.sum(mask_f32, axis=1), eps)).astype(jnp.float32)
    m3 = mask_f32.reshape(B, S, 1)

    tH, tS = _pick_tiles(B, S, H, itemsize)
    grid = (B, _cdiv(H, tH), _cdiv(S, tS))      # reduction (seq) axis last

    # Fast path: p known at trace time and a small positive integer (module init
    # p = 3) -> no per-element transcendentals (EUP was the binding unit).
    p_static = None
    try:
        p_val = float(jnp.asarray(p, jnp.float32).reshape(()))
        if 0.0 < p_val <= 16.0 and abs(p_val - round(p_val)) < 1e-6:
            p_static = int(round(p_val))
    except (TypeError, ValueError):             # traced p (inside jit/grad)
        p_static = None

    x_spec = pl.BlockSpec((1, tS, tH), lambda b, h, k: (b, k, h))
    m_spec = pl.BlockSpec((1, tS, 1), lambda b, h, k: (b, k, 0))
    smem = pl.BlockSpec(memory_space=pltpu.MemorySpace.SMEM)

    common = dict(
        out_shape=jax.ShapeDtypeStruct((B, 1, H), x.dtype),
        grid=grid,
        out_specs=pl.BlockSpec((1, 1, tH), lambda b, h, k: (b, 0, h)),
        scratch_shapes=[pltpu.VMEM((1, 1, tH), jnp.float32)],
        compiler_params=pltpu.CompilerParams(
            dimension_semantics=("parallel", "parallel", "arbitrary"),
            vmem_limit_bytes=32 * 1024 * 1024,
        ),
    )

    n_el = B * S * H
    bytes_accessed = n_el * itemsize + B * S * 4 + B * H * itemsize + B * 4

    if p_static is not None:
        kernel = functools.partial(
            _gem_kernel_int_p, eps=float(eps), p_int=p_static,
            inv_p=1.0 / float(p_static), seq_len=S, ts=tS)
        out = pl.pallas_call(
            kernel,
            in_specs=[smem, x_spec, m_spec],
            cost_estimate=pl.CostEstimate(
                flops=6 * n_el, transcendentals=2 * B * H,
                bytes_accessed=bytes_accessed),
            **common,
        )(inv_den, x, m3)
    else:
        p_scalar = jnp.asarray(p, jnp.float32).reshape(())
        scalars = jnp.stack([p_scalar, 1.0 / p_scalar])     # (2,) -> SMEM
        kernel = functools.partial(_gem_kernel_general, eps=float(eps),
                                   seq_len=S, ts=tS)
        out = pl.pallas_call(
            kernel,
            in_specs=[smem, smem, x_spec, m_spec],
            cost_estimate=pl.CostEstimate(
                flops=8 * n_el, transcendentals=2 * n_el + 2 * B * H,
                bytes_accessed=bytes_accessed),
            **common,
        )(scalars, inv_den, x, m3)

    return out.reshape(B, H)


def gem_text_reference(x, attention_mask, p, eps=1e-6):
    """Pure-JAX reference matching the PyTorch forward."""
    p = jnp.asarray(p, jnp.float32).reshape(())
    mask = attention_mask.astype(jnp.float32)[..., None]                 # (B, S, 1)
    mask_expanded = jnp.broadcast_to(mask, x.shape)                      # (B, S, H)
    num = jnp.sum((jnp.maximum(x, eps) * mask_expanded) ** p, axis=1)
    den = jnp.maximum(jnp.sum(mask_expanded, axis=1), eps)
    return (num / den) ** (1.0 / p)


if __name__ == "__main__":
    B, S, H = 2, 8, 32

    key = jax.random.PRNGKey(0)
    x = jax.random.normal(key, (B, S, H), dtype=jnp.float32)

    # Binary attention mask with different valid lengths per example.
    lengths = jnp.array([8, 5], dtype=jnp.int32)
    attention_mask = (jnp.arange(S)[None, :] < lengths[:, None]).astype(jnp.float32)

    # Deterministic parameter init: p = ones(1) * 3 (as in GeMText.__init__).
    p_param = jnp.ones((1,), dtype=jnp.float32) * 3.0
    eps = 1e-6

    # Integer-p fast path (p = 3).
    out = jax.block_until_ready(gem_text_pallas(x, attention_mask, p_param, eps))
    ref = gem_text_reference(x, attention_mask, p_param, eps)
    np.testing.assert_allclose(np.asarray(out), np.asarray(ref), rtol=1e-4, atol=1e-5)

    # General (non-integer / dynamic p) fallback path.
    p_frac = jnp.ones((1,), dtype=jnp.float32) * 2.5
    out2 = jax.block_until_ready(gem_text_pallas(x, attention_mask, p_frac, eps))
    ref2 = gem_text_reference(x, attention_mask, p_frac, eps)
    np.testing.assert_allclose(np.asarray(out2), np.asarray(ref2), rtol=1e-4, atol=1e-5)

    print("KERNEL_OK")
</pallas_src>

<mosaic_0001>
module attributes {stable_mosaic.version = 11 : i64} {
  func.func @_gem_kernel_int_p(%arg0: i32, %arg1: i32, %arg2: i32, %arg3: memref<2xf32, #tpu.memory_space<smem>>, %arg4: memref<1x8x32xf32, #tpu.memory_space<vmem>>, %arg5: memref<1x8x1xf32, #tpu.memory_space<vmem>>, %arg6: memref<1x1x32xf32, #tpu.memory_space<vmem>>, %arg7: memref<1x1x32xf32, #tpu.memory_space<vmem>>) attributes {dimension_semantics = [#tpu.dimension_semantics<parallel>, #tpu.dimension_semantics<parallel>, #tpu.dimension_semantics<arbitrary>], iteration_bounds = array<i64: 2, 1, 1>, scalar_prefetch = 0 : i64, scratch_operands = 1 : i64, tpu.core_type = #tpu.core_type<tc>, window_params = [{transform_indices = @transform_0, window_bounds = array<i64: 2>}, {transform_indices = @transform_1, window_bounds = array<i64: 1, 8, 32>}, {transform_indices = @transform_2, window_bounds = array<i64: 1, 8, 1>}, {transform_indices = @transform_3, window_bounds = array<i64: 1, 1, 32>}]} {
    %c0_i32 = arith.constant 0 : i32
    %0 = arith.cmpi eq, %arg2, %c0_i32 : i32
    %1 = arith.extui %0 : i1 to i32
    %c0_i32_0 = arith.constant 0 : i32
    %2 = arith.cmpi ne, %1, %c0_i32_0 : i32
    scf.if %2 {
      %cst_15 = arith.constant 0.000000e+00 : f32
      %19 = vector.broadcast %cst_15 : f32 to vector<1x1x32xf32>
      %c0_16 = arith.constant 0 : index
      %c0_17 = arith.constant 0 : index
      %c0_18 = arith.constant 0 : index
      %20 = vector.load %arg7[%c0_16, %c0_17, %c0_18] : memref<1x1x32xf32, #tpu.memory_space<vmem>>, vector<1x1x32xf32>
      tpu.vector_store %arg7[%c0_16, %c0_17, %c0_18], %19 {strides = array<i32>} : memref<1x1x32xf32, #tpu.memory_space<vmem>>, vector<1x1x32xf32>,
    } else {
    }
    %c0 = arith.constant 0 : index
    %c0_1 = arith.constant 0 : index
    %c0_2 = arith.constant 0 : index
    %3 = vector.load %arg4[%c0, %c0_1, %c0_2] : memref<1x8x32xf32, #tpu.memory_space<vmem>>, vector<1x8x32xf32>
    %c0_3 = arith.constant 0 : index
    %c0_4 = arith.constant 0 : index
    %c0_5 = arith.constant 0 : index
    %4 = vector.load %arg5[%c0_3, %c0_4, %c0_5] : memref<1x8x1xf32, #tpu.memory_space<vmem>>, vector<1x8x1xf32>
    %cst = arith.constant 9.99999997E-7 : f32
    %5 = vector.broadcast %cst : f32 to vector<1x8x32xf32>
    %6 = arith.maximumf %3, %5 : vector<1x8x32xf32>
    %7 = vector.broadcast %4 : vector<1x8x1xf32> to vector<1x8x32xf32>
    %8 = arith.mulf %6, %7 : vector<1x8x32xf32>
    %9 = arith.mulf %8, %8 : vector<1x8x32xf32>
    %10 = arith.mulf %8, %9 : vector<1x8x32xf32>
    %c0_6 = arith.constant 0 : index
    %c0_7 = arith.constant 0 : index
    %c0_8 = arith.constant 0 : index
    %11 = vector.load %arg7[%c0_6, %c0_7, %c0_8] : memref<1x1x32xf32, #tpu.memory_space<vmem>>, vector<1x1x32xf32>
    %cst_9 = arith.constant dense<0.000000e+00> : vector<1x32xf32>
    %12 = vector.multi_reduction <add>, %10, %cst_9 [1] : vector<1x8x32xf32> to vector<1x32xf32>
    %13 = vector.shape_cast %12 : vector<1x32xf32> to vector<1x1x32xf32>
    %14 = arith.addf %11, %13 : vector<1x1x32xf32>
    %c0_10 = arith.constant 0 : index
    %c0_11 = arith.constant 0 : index
    %c0_12 = arith.constant 0 : index
    %15 = vector.load %arg7[%c0_10, %c0_11, %c0_12] : memref<1x1x32xf32, #tpu.memory_space<vmem>>, vector<1x1x32xf32>
    tpu.vector_store %arg7[%c0_10, %c0_11, %c0_12], %14 {strides = array<i32>} : memref<1x1x32xf32, #tpu.memory_space<vmem>>, vector<1x1x32xf32>,
    %c0_i32_13 = arith.constant 0 : i32
    %16 = arith.cmpi eq, %arg2, %c0_i32_13 : i32
    %17 = arith.extui %16 : i1 to i32
    %c0_i32_14 = arith.constant 0 : i32
    %18 = arith.cmpi ne, %17, %c0_i32_14 : i32
    scf.if %18 {
      %c0_15 = arith.constant 0 : index
      %c0_16 = arith.constant 0 : index
      %c0_17 = arith.constant 0 : index
      %19 = vector.load %arg7[%c0_15, %c0_16, %c0_17] : memref<1x1x32xf32, #tpu.memory_space<vmem>>, vector<1x1x32xf32>
      %20 = arith.index_cast %arg0 : i32 to index
      %21 = memref.load %arg3[%20] : memref<2xf32, #tpu.memory_space<smem>>
      %22 = vector.broadcast %21 : f32 to vector<1x1x32xf32>
      %23 = arith.mulf %19, %22 : vector<1x1x32xf32>
      %cst_18 = arith.constant 0.000000e+00 : f32
      %24 = vector.broadcast %cst_18 : f32 to vector<1x1x32xf32>
      %25 = arith.cmpf ogt, %23, %24 : vector<1x1x32xf32>
      %cst_19 = arith.constant 1.000000e+00 : f32
      %26 = vector.broadcast %cst_19 : f32 to vector<1x1x32xf32>
      %27 = arith.select %25, %23, %26 : vector<1x1x32xi1>, vector<1x1x32xf32>
      %28 = math.log %27 : vector<1x1x32xf32>
      %cst_20 = arith.constant 0.333333343 : f32
      %29 = vector.broadcast %cst_20 : f32 to vector<1x1x32xf32>
      %30 = arith.mulf %29, %28 : vector<1x1x32xf32>
      %31 = math.exp %30 : vector<1x1x32xf32>
      %cst_21 = arith.constant 0.000000e+00 : f32
      %32 = vector.broadcast %cst_21 : f32 to vector<1x1x32xf32>
      %33 = arith.select %25, %31, %32 : vector<1x1x32xi1>, vector<1x1x32xf32>
      %c0_22 = arith.constant 0 : index
      %c0_23 = arith.constant 0 : index
      %c0_24 = arith.constant 0 : index
      %34 = vector.load %arg6[%c0_22, %c0_23, %c0_24] : memref<1x1x32xf32, #tpu.memory_space<vmem>>, vector<1x1x32xf32>
      tpu.vector_store %arg6[%c0_22, %c0_23, %c0_24], %33 {strides = array<i32>} : memref<1x1x32xf32, #tpu.memory_space<vmem>>, vector<1x1x32xf32>,
    } else {
    }
    return
  }
  func.func @transform_0(%arg0: i32, %arg1: i32, %arg2: i32) -> i32 {
    %c0_i32 = arith.constant 0 : i32
    %c0_i32_0 = arith.constant 0 : i32
    return %c0_i32 : i32
  }
  func.func @transform_1(%arg0: i32, %arg1: i32, %arg2: i32) -> (i32, i32, i32) {
    %c0_i32 = arith.constant 0 : i32
    return %arg0, %arg2, %arg1 : i32, i32, i32
  }
  func.func @transform_2(%arg0: i32, %arg1: i32, %arg2: i32) -> (i32, i32, i32) {
    %c0_i32 = arith.constant 0 : i32
    %c0_i32_0 = arith.constant 0 : i32
    return %arg0, %arg2, %c0_i32 : i32, i32, i32
  }
  func.func @transform_3(%arg0: i32, %arg1: i32, %arg2: i32) -> (i32, i32, i32) {
    %c0_i32 = arith.constant 0 : i32
    %c0_i32_0 = arith.constant 0 : i32
    return %arg0, %c0_i32, %arg1 : i32, i32, i32
  }
}

</mosaic_0001>

<bundles_post_ra>
// kernel: tpu_custom_call.1
= control target key start
LH: loop header
LB: loop body
LE: loop exit
PB: predicated region body
PF: predicated region fallthrough
CT: control target
= control target key end

     0   :  { %8 = vsyncpa [#allocation5], 0  ;;  %s724_s0 = inlined_call_operand.vmem [shape: f32[2], index: 0, kind: input, shape index: {}]   ;;  %s725_s1 = inlined_call_operand.vmem [shape: f32[2,8,32], index: 1, kind: input, shape index: {}]   ;;  %s726_s2 = inlined_call_operand.vmem [shape: f32[2,8,1], index: 2, kind: input, shape index: {}]   ;;  %s727_s3 = inlined_call_operand.hbm [shape: f32[2,1,32], index: 3, kind: output, shape index: {}]  }
   0x1   :  { %9 = vsyncpa [#allocation4], 0 }
   0x2   :  { %11 = vsyncpa [#allocation4 + $0x1], 0  ;;  %s615_s12 = smov 0   ;;  %s617_s13 = smov 0  }
   0x3   :  { %s619_s14 = smov 0   ;;  %s621_s15 = smov 0  }
   0x4   :  { %s623_s16 = smov 0   ;;  %s625_s17 = smov 0  }
   0x5 LB: > { %s409_s18 = sadd.s32 4294967295, %s590_s17   ;;  %s410_s19 = sadd.s32 4294967294, %s590_s17   ;;  %s590_s17 = sphi %s625_s17, %s17_s17   ;;  %s586_s16 = sphi %s623_s16, %s734_s16   ;;  %s582_s15 = sphi %s621_s15, %s733_s15   ;;  %s578_s14 = sphi %s619_s14, %s732_s14   ;;  %s574_s13 = sphi %s617_s13, %s731_s13   ;;  %s570_s12 = sphi %s615_s12, %s730_s12  }
   0x6   : > { %s36_s20 = sadd.s32 1, %s586_s16  ;;  %s124_s21 = sadd.s32 1, %s578_s14 }
   0x7   : > { %p38_p0 = scmp.ge.s32.totalorder %s36_s20, 2  ;;  %p134_p1 = scmp.ne.s32.totalorder %s578_s14, %s574_s13 }
   0x8   : > { %p135_p2 = scmp.eq.s32.totalorder %s409_s18, 1  ;;  %p140_p3 = scmp.ne.s32.totalorder %s574_s13, %s570_s12 }
   0x9   : > { %s736_s20 = smov (%p38_p0, %s36_s20), 0  ;;  %p141_p5 = scmp.eq.s32.totalorder %s410_s19, 1 }
   0xa   : > { %p655_p4 = por %p135_p2, %p134_p1  ;;  %s119_s23 = ssub.s32 %s586_s16, %s736_s20 }
   0xb   : > { %p411_p6 = scmp.ge.s32.totalorder %s590_s17, 1  ;;  %p122_p7 = scmp.eq.s32.totalorder %s119_s23, 0 }
   0xc   : > { %p662_p8 = por %p141_p5, %p140_p3  ;;  %p148_p9 = scmp.lt.s32.totalorder %s590_s17, 3 }
   0xd   : > { %s668_s25 = scalar_select %p122_p7, %s578_s14, %s124_s21  }
   0xe   : > { %p149_p10 = pnand %p411_p6, %p148_p9  ;;  %p434_p11 = scmp.eq.s32.totalorder %s409_s18, 0 }
   0xf   : > { %s160_s28 = sshll.u32 %s724_s0, 4  ;;  %s592_s29 = smov [#allocation3]   ;;  %s161_s28 = int_to_ptr.vmem [resolvable:$true] %s160_s28 }
  0x10   : > { %p426_p12 = pneg %p149_p10  ;;  %196 = sbr.rel (%p149_p10) target bundleno = 203 (0xcb), region = 32 }
  0x12   : > { %p427_p13 = pnand %p434_p11, %p426_p12 }
  0x14   : > { %429 = dma.vmem_to_smem (!%p427_p13), %s161_s28, 16, %s592_s29, [#allocation5]  }
  0x15   : > { %561 = dma.done.wait (%p434_p11), [#allocation5], 16  }
  0x16   : > { %563 = vsyncadd (%p434_p11), [#allocation5], 4294967280 }
  0x17   : > { %203 = sfence }
  0x18   : > { %p233_p0 = scmp.lt.s32.totalorder %s582_s15, 1  ;;  %v593_v0 = vmov 0   ;;  %vm254_vm0 = vcmask 253952   ;;  %v594_v2 = vmov 0.0   ;;  %vm268_vm1 = vcmask 261120   ;;  %s283_s11 = sld [smem:[#allocation3 + %s582_s15]] }
  0x19   : > { %488 = vset.pattern.permute.xlu0 %v593_v0  ;;  %255 = vst.msk [vmem:[#allocation2] sm:$0x1] %vm254_vm0, %v594_v2  ;;  %s231_s18 = sand.u32 1, %s574_s13   ;;  %s305_s23 = scalar_lea.hbm %s727_s3, %s582_s15 }
  0x1a   : > { %s234_s30 = scalar_select %p233_p0, %s582_s15, 1 }
  0x1b   : > { %s232_s26 = scalar_lea.vmem [#allocation6], %s231_s18  ;;  %s309_s28 = sshll.u32 %s305_s23, 4  ;;  %s310_s28 = int_to_ptr.hbm [resolvable:$true] %s309_s28 }
  0x1c   : > { %s416_s4 = sshll.u32 %s234_s30, 3  ;;  %s307_s27 = sshll.u32 %s232_s26, 4  ;;  %s308_s27 = int_to_ptr.vmem [resolvable:$true] %s307_s27 }
  0x1d   : > { %s249_s7 = scalar_lea.vmem %s726_s2, %s416_s4  ;;  %s242_s10 = scalar_lea.vmem %s725_s1, %s416_s4 }
  0x1e   : > { %v257_v1 = vld [vmem:[%s249_s7] sm:$0xff]  ;;  %v284_v18 = vstv %s283_s11  ;;  %s296_s29 = scalar_lea.sflag [#allocation4], %s231_s18  ;;  %s522_s30 = sshra.s32 %s310_s28, 4  ;;  %s523_s30 = int_to_ptr.hbm [resolvable:$true] %s522_s30 }
  0x1f   : > { %261 = vperm.xlu0 %488, %v257_v1   ;;  %v256_v3 = vld [vmem:[%s242_s10] sm:$0xff]  ;;  %s524_s4 = scalar_lea.hbm %s523_s30, 1  ;;  %s528_s6 = scalar_lea.hbm %s727_s3, 2 }
  0x20   : > { %v258_v4 = vmax.f32 %v256_v3, 1e-06  ;;  %v267_v15 = vld [vmem:[#allocation2] sm:$0x1]  ;;  %p525_p1 = scmp.ne.s32.totalorder %s523_s30, %s524_s4  ;;  %p529_p5 = scmp.lt.s32.totalorder %s523_s30, %s727_s3 }
  0x21   : > { %p530_p6 = scmp.lt.s32.totalorder %s528_s6, %s524_s4 }
  0x22   : > { %p526_p2 = pnand %p525_p1, %p655_p4 }
  0x23   : > { %p531_p7 = por %p530_p6, %p529_p5 }
  0x24   : > { %p527_p3 = pneg %p526_p2 }
  0x26   : > { %p532_p9 = pnand %p531_p7, %p527_p3 }
  0x91   : > { %v262_v5 = vpop.permute.xlu0 %261 }
  0x92   : > { %v264_v6 = vmul.f32 %v262_v5, %v258_v4 }
  0x94   : > { %v265_v7 = vmul.f32 %v264_v6, %v264_v6 }
  0x96   : > { %v266_v8 = vmul.f32 %v265_v7, %v264_v6 }
  0x98   : > { %v269_v9 = vsel %vm268_vm1, %v266_v8, 0.0 }
  0x99   : > { %v270_v10 = vrot.slane %v269_v9, 4 }
  0x9b   : > { %v271_v11 = vadd.f32 %v270_v10, %v269_v9 }
  0x9d   : > { %v272_v12 = vrot.slane %v271_v11, 2 }
  0x9f   : > { %v273_v13 = vadd.f32 %v272_v12, %v271_v11 }
  0xa1   : > { %v274_v14 = vrot.slane %v273_v13, 1 }
  0xa3   : > { %v275_v16 = vadd.f32 %v274_v14, %v273_v13 }
  0xa5   : > { %v276_v17 = vadd.f32 %v275_v16, %v267_v15 }
  0xa7   : > { %278 = vst.msk [vmem:[#allocation2] sm:$0x1] %vm254_vm0, %v276_v17 }
  0xae   : > { %v282_v19 = vld [vmem:[#allocation2] sm:$0x1] }
  0xaf   : > { %v285_v20 = vmul.f32 %v284_v18, %v282_v19 }
  0xb1   : > { %vm286_vm2 = vcmp.gt.f32.partialorder %v285_v20, 0.0 }
  0xb2   : > { %v287_v21 = vsel %vm286_vm2, %v285_v20, 1.0 }
  0xb3   : > { %489 = vlog2.f32 %v287_v21 }
  0xb9   : > { %v490_v22 = vpop.eup %489 }
  0xba   : > { %v289_v23 = vmul.f32 0.6931472, %v490_v22 }
  0xbc   : > { %v290_v24 = vmul.f32 0.33333334, %v289_v23 }
  0xbe   : > { %v291_v25 = vmul.f32 1.442695, %v290_v24 }
  0xc0   : > { %491 = vpow2.f32 %v291_v25 }
  0xc6   : > { %v492_v26 = vpop.eup %491 }
  0xc7   : > { %v293_v27 = vsel %vm286_vm2, %v492_v26, 0.0 }
  0xc8   : > { %294 = vst.msk [vmem:[%s232_s26] sm:$0x1] %vm254_vm0, %v293_v27 }
  0xc9   : > { %535 = shalt.err (!%p532_p9)
}
  0xca   : > { %424 = dma.vmem_to_hbm [thread:$0]  (%p655_p4), %s308_s27, 16, %s310_s28, %s296_s29  }
  0xcb PF: > { %p436_p10 = scmp.ge.s32.totalorder %s590_s17, 2  ;;  %s321_s9 = sand.u32 1, %s570_s12  }
  0xcc   : > { %s322_s10 = scalar_lea.sflag [#allocation4], %s321_s9 }
  0xcd   : > { %p431_p11 = pnand %p436_p10, %p662_p8 }
  0xcf   : > { %p432_p12 = pneg %p431_p11 }
  0xd1   : > { %565 = dma.done.wait (%p432_p12), %s322_s10, 16  }
  0xd2   : > { %567 = vsyncadd (%p432_p12), %s322_s10, 4294967280  ;;  %s17_s17 = sadd.s32 1, %s590_s17   ;;  %s730_s12 = smov %s574_s13 }
  0xd3   : > { %p14_p13 = scmp.ge.s32.totalorder %s17_s17, 4   ;;  %s731_s13 = smov %s578_s14 }
  0xd4   : > { %s732_s14 = smov %s668_s25  ;;  %s733_s15 = smov %s586_s16 }
  0xd5   : > { %s734_s16 = smov %s736_s20  ;;  %16 = sbr.rel (!%p14_p13) target bundleno = 5 (0x5), region = 83 }
  0xda   :  { %327 = vsyncpa [#allocation4], 1 }
  0xdb   :  { %329 = vsyncpa [#allocation4 + $0x1], 1 }
  0xdc   :  { %330 = vsyncpa [#allocation5], 1 }
  0xdd   :  { %332 = vsyncpa [#allocation5 + $0x1], 1 }

</bundles_post_ra>
